<compile_context>
chip_gen: v6e
topology: v6e:2x2x1
jax: 0.10.0
libtpu: 0.0.40
codegen_flags: <defaults>
</compile_context>

<pallas_src>
import functools

import jax
import jax.numpy as jnp
from jax.experimental import pallas as pl
from jax.experimental.pallas import tpu as pltpu

LANE = 128
SUBLANE = 8
UNORM_EPS = 1e-10    # UnparametricNorm defaults
UNORM_SCALE = 10.0


def _round_up(x, m):
    return (x + m - 1) // m * m


def _elu(y):
    # ELU(alpha=1); clamp the exp argument so the unselected branch never overflows.
    return jnp.where(y > 0.0, y, jnp.exp(jnp.minimum(y, 0.0)) - 1.0)


def _make_mlp_kernel(num_layers, penultimate_norm, matmul_dtype):
    """Kernel refs: (x, w0, b0, w1, b1, ..., w_{L-1}, b_{L-1}, out)."""

    def kernel(*refs):
        x_ref, out_ref = refs[0], refs[-1]
        wb = refs[1:-1]

        h = x_ref[...].astype(jnp.float32)
        for li in range(num_layers):
            w = wb[2 * li][...]                      # already matmul_dtype (bf16)
            b = wb[2 * li + 1][...]                  # f32, shape (1, d_out_p)
            y = jnp.dot(h.astype(matmul_dtype), w,
                        preferred_element_type=jnp.float32) + b
            if li < num_layers - 1:
                y = _elu(y)
                if penultimate_norm and li == num_layers - 2:
                    nrm = jnp.sqrt(jnp.sum(y * y, axis=-1, keepdims=True))
                    y = y * (UNORM_SCALE / jnp.maximum(nrm, UNORM_EPS))
            h = y
        out_ref[...] = h.astype(out_ref.dtype)

    return kernel


def init_mlp_params(key, in_dim, hidden_dims, out_dim):
    """Synthetic parameters matching the PyTorch module's shapes.

    Weights are stored as [fan_in, fan_out] (transposed vs. torch)."""
    if isinstance(hidden_dims, int):
        hidden_dims = [hidden_dims]
    dims = [in_dim] + list(hidden_dims) + [out_dim]
    weights = []
    for i in range(len(dims) - 1):
        key, kw, kb = jax.random.split(key, 3)
        scale = 1.0 / jnp.sqrt(jnp.float32(dims[i]))
        w = jax.random.normal(kw, (dims[i], dims[i + 1]), jnp.float32) * scale
        b = jax.random.normal(kb, (dims[i + 1],), jnp.float32) * 0.1
        weights.append((w, b))
    return {"weights": weights, "dims": dims}


def mlp_forward(params, x, *, penultimate_norm=False, tile_b=256,
                matmul_dtype=jnp.bfloat16):
    """Fused Pallas MLP forward.  x: [B, in_dim] float32 -> [B, out_dim] float32."""
    weights = params["weights"]
    num_layers = len(weights)
    B, in_dim = x.shape
    dims = [in_dim] + [w.shape[1] for (w, _) in weights]
    dims_p = [_round_up(d, LANE) for d in dims]
    out_dim, out_p = dims[-1], dims_p[-1]

    # Batch tiling: multiple of 8 sublanes, padded batch, 1-D parallel grid.
    tile_b = _round_up(min(tile_b, _round_up(B, SUBLANE)), SUBLANE)
    B_p = _round_up(B, tile_b)
    grid = (B_p // tile_b,)

    x_p = jnp.pad(x.astype(jnp.float32),
                  ((0, B_p - B), (0, dims_p[0] - in_dim)))

    args = [x_p]
    in_specs = [pl.BlockSpec((tile_b, dims_p[0]), lambda i: (i, 0))]
    for li, (w, b) in enumerate(weights):
        din_p, dout_p = dims_p[li], dims_p[li + 1]
        w_p = jnp.pad(w, ((0, din_p - w.shape[0]), (0, dout_p - w.shape[1])))
        b_p = jnp.pad(b, (0, dout_p - b.shape[0])).reshape(1, dout_p)
        args.append(w_p.astype(matmul_dtype))        # halve weight HBM traffic
        args.append(b_p.astype(jnp.float32))
        # Constant index maps: weights/biases stay resident across grid steps.
        in_specs.append(pl.BlockSpec((din_p, dout_p), lambda i: (0, 0)))
        in_specs.append(pl.BlockSpec((1, dout_p), lambda i: (0, 0)))

    kernel = _make_mlp_kernel(num_layers, penultimate_norm, matmul_dtype)

    # Scoped-VMEM budget: double-buffered x/out tiles + resident weights +
    # f32 activations, clamped to [16 MiB, 48 MiB] (under v7x's 64 MiB).
    weight_bytes = sum(int(a.size) * a.dtype.itemsize for a in args[1:])
    io_tile_bytes = tile_b * (dims_p[0] + out_p) * 4
    act_bytes = 4 * tile_b * max(dims_p) * 4
    vmem_limit = int(max(16 << 20,
                         min(48 << 20,
                             2 * io_tile_bytes + weight_bytes + act_bytes
                             + (2 << 20))))

    out_padded = pl.pallas_call(
        kernel,
        out_shape=jax.ShapeDtypeStruct((B_p, out_p), jnp.float32),
        grid=grid,
        in_specs=in_specs,
        out_specs=pl.BlockSpec((tile_b, out_p), lambda i: (i, 0)),
        compiler_params=pltpu.CompilerParams(
            dimension_semantics=("parallel",),
            vmem_limit_bytes=vmem_limit),
    )(*args)

    return out_padded[:B, :out_dim]


def mlp_reference(params, x, *, penultimate_norm=False,
                  matmul_dtype=jnp.bfloat16):
    """Pure-JAX reference with identical dtype handling (bf16 matmul, f32 else)."""
    weights = params["weights"]
    n = len(weights)
    h = x.astype(jnp.float32)
    for li, (w, b) in enumerate(weights):
        y = jnp.dot(h.astype(matmul_dtype), w.astype(matmul_dtype),
                    preferred_element_type=jnp.float32) + b
        if li < n - 1:
            y = _elu(y)
            if penultimate_norm and li == n - 2:
                nrm = jnp.sqrt(jnp.sum(y * y, axis=-1, keepdims=True))
                y = y * (UNORM_SCALE / jnp.maximum(nrm, UNORM_EPS))
        h = y
    return h


if __name__ == "__main__":
    key = jax.random.PRNGKey(0)

    # --- Config A: small shapes, penultimate UnparametricNorm enabled ---
    B, IN_DIM, HIDDEN, OUT_DIM = 16, 32, [64, 64], 8
    k_p, k_x, key = jax.random.split(key, 3)
    params_a = init_mlp_params(k_p, IN_DIM, HIDDEN, OUT_DIM)
    x_a = jax.random.normal(k_x, (B, IN_DIM), jnp.float32)

    out_a = jax.block_until_ready(
        mlp_forward(params_a, x_a, penultimate_norm=True))
    ref_a = mlp_reference(params_a, x_a, penultimate_norm=True)
    assert out_a.shape == (B, OUT_DIM)
    assert jnp.allclose(out_a, ref_a, atol=1e-3, rtol=1e-3)

    # --- Config B: batch larger than one tile -> exercises the parallel grid
    #     and ragged-batch padding; single hidden layer, no penultimate norm ---
    B2 = 272
    k_p2, k_x2, key = jax.random.split(key, 3)
    params_b = init_mlp_params(k_p2, IN_DIM, [64], OUT_DIM)
    x_b = jax.random.normal(k_x2, (B2, IN_DIM), jnp.float32)

    out_b = jax.block_until_ready(
        mlp_forward(params_b, x_b, penultimate_norm=False, tile_b=128))
    ref_b = mlp_reference(params_b, x_b, penultimate_norm=False)
    assert out_b.shape == (B2, OUT_DIM)
    assert jnp.allclose(out_b, ref_b, atol=1e-3, rtol=1e-3)

    print("KERNEL_OK")
</pallas_src>

<mosaic_0001>
module attributes {stable_mosaic.version = 11 : i64} {
  func.func @kernel(%arg0: i32, %arg1: memref<16x128xf32, #tpu.memory_space<vmem>>, %arg2: memref<128x128xbf16, #tpu.memory_space<vmem>>, %arg3: memref<1x128xf32, #tpu.memory_space<vmem>>, %arg4: memref<128x128xbf16, #tpu.memory_space<vmem>>, %arg5: memref<1x128xf32, #tpu.memory_space<vmem>>, %arg6: memref<128x128xbf16, #tpu.memory_space<vmem>>, %arg7: memref<1x128xf32, #tpu.memory_space<vmem>>, %arg8: memref<16x128xf32, #tpu.memory_space<vmem>>) attributes {dimension_semantics = [#tpu.dimension_semantics<parallel>], iteration_bounds = array<i64: 1>, scalar_prefetch = 0 : i64, scratch_operands = 0 : i64, tpu.core_type = #tpu.core_type<tc>, window_params = [{transform_indices = @transform_0, window_bounds = array<i64: 16, 128>}, {pipeline_mode = #tpu.pipeline_mode<synchronous>, transform_indices = @transform_1, window_bounds = array<i64: 128, 128>}, {pipeline_mode = #tpu.pipeline_mode<synchronous>, transform_indices = @transform_2, window_bounds = array<i64: 1, 128>}, {pipeline_mode = #tpu.pipeline_mode<synchronous>, transform_indices = @transform_3, window_bounds = array<i64: 128, 128>}, {pipeline_mode = #tpu.pipeline_mode<synchronous>, transform_indices = @transform_4, window_bounds = array<i64: 1, 128>}, {pipeline_mode = #tpu.pipeline_mode<synchronous>, transform_indices = @transform_5, window_bounds = array<i64: 128, 128>}, {pipeline_mode = #tpu.pipeline_mode<synchronous>, transform_indices = @transform_6, window_bounds = array<i64: 1, 128>}, {transform_indices = @transform_7, window_bounds = array<i64: 16, 128>}]} {
    %c0 = arith.constant 0 : index
    %c0_0 = arith.constant 0 : index
    %0 = vector.load %arg1[%c0, %c0_0] : memref<16x128xf32, #tpu.memory_space<vmem>>, vector<16x128xf32>
    %c0_1 = arith.constant 0 : index
    %c0_2 = arith.constant 0 : index
    %1 = vector.load %arg2[%c0_1, %c0_2] : memref<128x128xbf16, #tpu.memory_space<vmem>>, vector<128x128xbf16>
    %c0_3 = arith.constant 0 : index
    %c0_4 = arith.constant 0 : index
    %2 = vector.load %arg3[%c0_3, %c0_4] : memref<1x128xf32, #tpu.memory_space<vmem>>, vector<1x128xf32>
    %3 = arith.truncf %0 : vector<16x128xf32> to vector<16x128xbf16>
    %cst = arith.constant dense<0.000000e+00> : vector<16x128xf32>
    %4 = tpu.matmul %3, %1, %cst {dimension_numbers = #tpu.dot_dimension_numbers<[1], [0], [0], [1], [0, 0, 1, 1], [], []>} : vector<16x128xbf16>, vector<128x128xbf16>, vector<16x128xf32> -> vector<16x128xf32>
    %5 = vector.broadcast %2 : vector<1x128xf32> to vector<16x128xf32>
    %6 = arith.addf %4, %5 : vector<16x128xf32>
    %cst_5 = arith.constant 0.000000e+00 : f32
    %7 = vector.broadcast %cst_5 : f32 to vector<16x128xf32>
    %8 = arith.cmpf ogt, %6, %7 : vector<16x128xf32>
    %cst_6 = arith.constant 0.000000e+00 : f32
    %9 = vector.broadcast %cst_6 : f32 to vector<16x128xf32>
    %10 = arith.minimumf %6, %9 : vector<16x128xf32>
    %11 = math.exp %10 : vector<16x128xf32>
    %cst_7 = arith.constant 1.000000e+00 : f32
    %12 = vector.broadcast %cst_7 : f32 to vector<16x128xf32>
    %13 = arith.subf %11, %12 : vector<16x128xf32>
    %14 = arith.select %8, %6, %13 : vector<16x128xi1>, vector<16x128xf32>
    %c0_8 = arith.constant 0 : index
    %c0_9 = arith.constant 0 : index
    %15 = vector.load %arg4[%c0_8, %c0_9] : memref<128x128xbf16, #tpu.memory_space<vmem>>, vector<128x128xbf16>
    %c0_10 = arith.constant 0 : index
    %c0_11 = arith.constant 0 : index
    %16 = vector.load %arg5[%c0_10, %c0_11] : memref<1x128xf32, #tpu.memory_space<vmem>>, vector<1x128xf32>
    %17 = arith.truncf %14 : vector<16x128xf32> to vector<16x128xbf16>
    %cst_12 = arith.constant dense<0.000000e+00> : vector<16x128xf32>
    %18 = tpu.matmul %17, %15, %cst_12 {dimension_numbers = #tpu.dot_dimension_numbers<[1], [0], [0], [1], [0, 0, 1, 1], [], []>} : vector<16x128xbf16>, vector<128x128xbf16>, vector<16x128xf32> -> vector<16x128xf32>
    %19 = vector.broadcast %16 : vector<1x128xf32> to vector<16x128xf32>
    %20 = arith.addf %18, %19 : vector<16x128xf32>
    %cst_13 = arith.constant 0.000000e+00 : f32
    %21 = vector.broadcast %cst_13 : f32 to vector<16x128xf32>
    %22 = arith.cmpf ogt, %20, %21 : vector<16x128xf32>
    %cst_14 = arith.constant 0.000000e+00 : f32
    %23 = vector.broadcast %cst_14 : f32 to vector<16x128xf32>
    %24 = arith.minimumf %20, %23 : vector<16x128xf32>
    %25 = math.exp %24 : vector<16x128xf32>
    %cst_15 = arith.constant 1.000000e+00 : f32
    %26 = vector.broadcast %cst_15 : f32 to vector<16x128xf32>
    %27 = arith.subf %25, %26 : vector<16x128xf32>
    %28 = arith.select %22, %20, %27 : vector<16x128xi1>, vector<16x128xf32>
    %29 = arith.mulf %28, %28 : vector<16x128xf32>
    %cst_16 = arith.constant dense<0.000000e+00> : vector<16xf32>
    %30 = vector.multi_reduction <add>, %29, %cst_16 [1] : vector<16x128xf32> to vector<16xf32>
    %31 = vector.shape_cast %30 : vector<16xf32> to vector<16x1xf32>
    %32 = math.sqrt %31 : vector<16x1xf32>
    %cst_17 = arith.constant 1.000000e-10 : f32
    %33 = vector.broadcast %cst_17 : f32 to vector<16x1xf32>
    %34 = arith.maximumf %32, %33 : vector<16x1xf32>
    %cst_18 = arith.constant 1.000000e+01 : f32
    %35 = vector.broadcast %cst_18 : f32 to vector<16x1xf32>
    %36 = arith.divf %35, %34 : vector<16x1xf32>
    %37 = vector.broadcast %36 : vector<16x1xf32> to vector<16x128xf32>
    %38 = arith.mulf %28, %37 : vector<16x128xf32>
    %c0_19 = arith.constant 0 : index
    %c0_20 = arith.constant 0 : index
    %39 = vector.load %arg6[%c0_19, %c0_20] : memref<128x128xbf16, #tpu.memory_space<vmem>>, vector<128x128xbf16>
    %c0_21 = arith.constant 0 : index
    %c0_22 = arith.constant 0 : index
    %40 = vector.load %arg7[%c0_21, %c0_22] : memref<1x128xf32, #tpu.memory_space<vmem>>, vector<1x128xf32>
    %41 = arith.truncf %38 : vector<16x128xf32> to vector<16x128xbf16>
    %cst_23 = arith.constant dense<0.000000e+00> : vector<16x128xf32>
    %42 = tpu.matmul %41, %39, %cst_23 {dimension_numbers = #tpu.dot_dimension_numbers<[1], [0], [0], [1], [0, 0, 1, 1], [], []>} : vector<16x128xbf16>, vector<128x128xbf16>, vector<16x128xf32> -> vector<16x128xf32>
    %43 = vector.broadcast %40 : vector<1x128xf32> to vector<16x128xf32>
    %44 = arith.addf %42, %43 : vector<16x128xf32>
    %c0_24 = arith.constant 0 : index
    %c0_25 = arith.constant 0 : index
    %45 = vector.load %arg8[%c0_24, %c0_25] : memref<16x128xf32, #tpu.memory_space<vmem>>, vector<16x128xf32>
    tpu.vector_store %arg8[%c0_24, %c0_25], %44 {strides = array<i32>} : memref<16x128xf32, #tpu.memory_space<vmem>>, vector<16x128xf32>,
    return
  }
  func.func @transform_0(%arg0: i32) -> (i32, i32) {
    %c0_i32 = arith.constant 0 : i32
    %c0_i32_0 = arith.constant 0 : i32
    return %arg0, %c0_i32 : i32, i32
  }
  func.func @transform_1(%arg0: i32) -> (i32, i32) {
    %c0_i32 = arith.constant 0 : i32
    %c0_i32_0 = arith.constant 0 : i32
    %c0_i32_1 = arith.constant 0 : i32
    return %c0_i32, %c0_i32_0 : i32, i32
  }
  func.func @transform_2(%arg0: i32) -> (i32, i32) {
    %c0_i32 = arith.constant 0 : i32
    %c0_i32_0 = arith.constant 0 : i32
    %c0_i32_1 = arith.constant 0 : i32
    return %c0_i32, %c0_i32_0 : i32, i32
  }
  func.func @transform_3(%arg0: i32) -> (i32, i32) {
    %c0_i32 = arith.constant 0 : i32
    %c0_i32_0 = arith.constant 0 : i32
    %c0_i32_1 = arith.constant 0 : i32
    return %c0_i32, %c0_i32_0 : i32, i32
  }
  func.func @transform_4(%arg0: i32) -> (i32, i32) {
    %c0_i32 = arith.constant 0 : i32
    %c0_i32_0 = arith.constant 0 : i32
    %c0_i32_1 = arith.constant 0 : i32
    return %c0_i32, %c0_i32_0 : i32, i32
  }
  func.func @transform_5(%arg0: i32) -> (i32, i32) {
    %c0_i32 = arith.constant 0 : i32
    %c0_i32_0 = arith.constant 0 : i32
    %c0_i32_1 = arith.constant 0 : i32
    return %c0_i32, %c0_i32_0 : i32, i32
  }
  func.func @transform_6(%arg0: i32) -> (i32, i32) {
    %c0_i32 = arith.constant 0 : i32
    %c0_i32_0 = arith.constant 0 : i32
    %c0_i32_1 = arith.constant 0 : i32
    return %c0_i32, %c0_i32_0 : i32, i32
  }
  func.func @transform_7(%arg0: i32) -> (i32, i32) {
    %c0_i32 = arith.constant 0 : i32
    %c0_i32_0 = arith.constant 0 : i32
    return %arg0, %c0_i32 : i32, i32
  }
}

</mosaic_0001>

<bundles_post_ra>
// kernel: tpu_custom_call.1
= control target key start
LH: loop header
LB: loop body
LE: loop exit
PB: predicated region body
PF: predicated region fallthrough
CT: control target
= control target key end

     0   :  { %12 = vsyncpa [#allocation3], 0  ;;  %s894_s0 = inlined_call_operand.hbm [shape: f32[16,128], index: 0, kind: input, shape index: {}]   ;;  %s895_s1 = inlined_call_operand.hbm [shape: bf16[128,128], index: 1, kind: input, shape index: {}]   ;;  %s896_s2 = inlined_call_operand.vmem [shape: f32[1,128], index: 2, kind: input, shape index: {}]   ;;  %s897_s3 = inlined_call_operand.hbm [shape: bf16[128,128], index: 3, kind: input, shape index: {}]   ;;  %s898_s4 = inlined_call_operand.vmem [shape: f32[1,128], index: 4, kind: input, shape index: {}]   ;;  %s899_s5 = inlined_call_operand.hbm [shape: bf16[128,128], index: 5, kind: input, shape index: {}]   ;;  %s900_s6 = inlined_call_operand.vmem [shape: f32[1,128], index: 6, kind: input, shape index: {}]   ;;  %s901_s7 = inlined_call_operand.hbm [shape: f32[16,128], index: 7, kind: output, shape index: {}]  }
   0x1   :  { %13 = vsyncpa [#allocation6], 0 }
   0x2   :  { %14 = vsyncpa [#allocation9], 0 }
   0x3   :  { %15 = vsyncpa [#allocation4], 0  ;;  %s774_s24 = smov [#allocation5]  }
   0x4   :  { %s33_s25 = sshll.u32 %s774_s24, 4  ;;  %s34_s25 = int_to_ptr.vmem [resolvable:$true] %s33_s25 }
   0x5   :  { %s674_s26 = scalar_lea.vmem %s34_s25, 1024  ;;  %p679_p1 = scmp.lt.s32.totalorder %s34_s25, %s34_s25 }
   0x6   :  { %p675_p0 = scmp.ne.s32.totalorder %s34_s25, %s674_s26  ;;  %p680_p2 = scmp.lt.s32.totalorder %s674_s26, %s674_s26 }
   0x8   :  { %p681_p3 = por %p680_p2, %p679_p1 }
   0xa   :  { %p682_p4 = pnand %p681_p3, %p675_p0 }
   0xc   :  { %685 = shalt.err (!%p682_p4)
}
   0xd   :  { %s775_s27 = smov 64   ;;  %s776_s28 = smov 4  }
   0xe   :  { %39 = dma.hbm_to_vmem [thread:$0]  %s895_s1, 1024, %s34_s25, [#allocation6], %s775_s27, %s775_s27, %s776_s28  }
   0xf   :  { %s777_s8 = smov [#allocation2]  }
  0x10   :  { %s21_s9 = sshll.u32 %s777_s8, 4  ;;  %s22_s9 = int_to_ptr.vmem [resolvable:$true] %s21_s9 }
  0x11   :  { %s694_s10 = scalar_lea.vmem %s22_s9, 256  ;;  %p699_p6 = scmp.lt.s32.totalorder %s22_s9, %s22_s9 }
  0x12   :  { %p695_p5 = scmp.ne.s32.totalorder %s22_s9, %s694_s10  ;;  %p700_p7 = scmp.lt.s32.totalorder %s694_s10, %s694_s10 }
  0x14   :  { %p701_p8 = por %p700_p7, %p699_p6 }
  0x16   :  { %p702_p9 = pnand %p701_p8, %p695_p5 }
  0x18   :  { %705 = shalt.err (!%p702_p9)
}
  0x19   :  { %s778_s11 = smov 128   ;;  %s779_s12 = smov 8  }
  0x1a   :  { %27 = dma.hbm_to_vmem [thread:$0]  %s894_s0, 256, %s22_s9, [#allocation3], %s778_s11, %s778_s11, %s779_s12  }
  0x1b   :  { %s780_s1 = smov [#allocation7]   ;;  %s781_s16 = smov [#allocation8]  }
  0x1c   :  { %s47_s15 = sshll.u32 %s780_s1, 4  ;;  %s61_s17 = sshll.u32 %s781_s16, 4  ;;  %s48_s15 = int_to_ptr.vmem [resolvable:$true] %s47_s15  ;;  %s62_s17 = int_to_ptr.vmem [resolvable:$true] %s61_s17 }
  0x1d   :  { %s714_s18 = scalar_lea.vmem %s48_s15, 1024  ;;  %p719_p11 = scmp.lt.s32.totalorder %s48_s15, %s48_s15 }
  0x1e   :  { %p715_p10 = scmp.ne.s32.totalorder %s48_s15, %s714_s18  ;;  %p720_p12 = scmp.lt.s32.totalorder %s714_s18, %s714_s18 }
  0x20   :  { %p721_p13 = por %p720_p12, %p719_p11 }
  0x22   :  { %p722_p0 = pnand %p721_p13, %p715_p10 }
  0x24   :  { %725 = shalt.err (!%p722_p0)
}
  0x25   :  { %53 = dma.hbm_to_vmem [thread:$0]  %s897_s3, 1024, %s48_s15, [#allocation6], %s775_s27, %s775_s27, %s776_s28  }
  0x26   :  { %s734_s0 = scalar_lea.vmem %s62_s17, 1024  ;;  %p739_p2 = scmp.lt.s32.totalorder %s62_s17, %s62_s17 }
  0x27   :  { %p735_p1 = scmp.ne.s32.totalorder %s62_s17, %s734_s0  ;;  %p740_p3 = scmp.lt.s32.totalorder %s734_s0, %s734_s0 }
  0x29   :  { %p741_p4 = por %p740_p3, %p739_p2 }
  0x2b   :  { %p742_p5 = pnand %p741_p4, %p735_p1 }
  0x2d   :  { %745 = shalt.err (!%p742_p5)
}
  0x2e   :  { %67 = dma.hbm_to_vmem [thread:$0]  %s899_s5, 1024, %s62_s17, [#allocation9], %s775_s27, %s775_s27, %s776_s28  }
  0x2f   :  { %766 = dma.done.wait [#allocation3], 256  }
  0x30   :  { %767 = vsyncadd [#allocation3], 4294967040 }
  0x31   :  { %768 = dma.done.wait [#allocation6], 2048  }
  0x32   :  { %769 = vsyncadd [#allocation6], 4294965248 }
  0x33   :  { %770 = dma.done.wait [#allocation9], 1024  }
  0x34   :  { %771 = vsyncadd [#allocation9], 4294966272  ;;  %v782_v0 = vmov 0.0   ;;  %vm783_vm0 = vmmov 0   ;;  %v626_v1 = vld [vmem:[#allocation5 + $0x38] sm:$0xff]   ;;  %v627_v2 = vld [vmem:[#allocation5 + $0x30] sm:$0xff]  }
  0x35   :  { %555 = vmatprep.subr.bf16.mxu0 %v782_v0  ;;  %571 = vmatprep.mubr.msk.bf16.mxu0 %vm783_vm0, %v782_v0  ;;  %v628_v3 = vld [vmem:[#allocation5 + $0x28] sm:$0xff]   ;;  %v629_v4 = vld [vmem:[#allocation5 + $0x20] sm:$0xff]   ;;  %v634_v5 = vld [vmem:[#allocation7 + $0x38] sm:$0xff]   ;;  %s784_s25 = smov [#allocation10]  }
  0x36   :  { %575 = vmatprep.subr.bf16.mxu1 %v782_v0  ;;  %591 = vmatprep.mubr.msk.bf16.mxu1 %vm783_vm0, %v782_v0  ;;  %v630_v6 = vld [vmem:[#allocation5 + $0x18] sm:$0xff]   ;;  %v631_v7 = vld [vmem:[#allocation5 + $0x10] sm:$0xff]   ;;  %v632_v8 = vld [vmem:[#allocation5 + $0x8] sm:$0xff]   ;;  %s483_s26 = sshll.u32 %s784_s25, 4  ;;  %s484_s26 = int_to_ptr.vmem [resolvable:$true] %s483_s26 }
  0x37   :  { %556 = vmatpush3.bf16.msra.mxu0 %v626_v1  ;;  %576 = vmatpush3.bf16.msra.mxu1 %v634_v5  ;;  %v633_v9 = vld [vmem:[#allocation5] sm:$0xff]   ;;  %v83_v10 = vld [vmem:[#allocation2] sm:$0xff]  ;;  %v84_v11 = vld [vmem:[#allocation2 + $0x8] sm:$0xff]  ;;  %s746_s27 = scalar_lea.vmem %s484_s26, 256  ;;  %p751_p7 = scmp.lt.s32.totalorder %s484_s26, %s484_s26 }
  0x38   :  { %557 = vmatprep.subr.bf16.mxu0 %v782_v0  ;;  %577 = vmatprep.subr.bf16.mxu1 %v782_v0  ;;  %v102_v12 = vpack.c.bf16 %v84_v11, %v83_v10  ;;  %v635_v13 = vld [vmem:[#allocation7 + $0x30] sm:$0xff]   ;;  %v636_v14 = vld [vmem:[#allocation7 + $0x28] sm:$0xff]   ;;  %v637_v15 = vld [vmem:[#allocation7 + $0x20] sm:$0xff]   ;;  %p747_p6 = scmp.ne.s32.totalorder %s484_s26, %s746_s27  ;;  %p752_p8 = scmp.lt.s32.totalorder %s746_s27, %s746_s27 }
  0x39   :  { %v638_v16 = vld [vmem:[#allocation7 + $0x18] sm:$0xff]   ;;  %v639_v17 = vld [vmem:[#allocation7 + $0x10] sm:$0xff]   ;;  %v640_v18 = vld [vmem:[#allocation7 + $0x8] sm:$0xff]  }
  0x3a   :  { %v641_v19 = vld [vmem:[#allocation7] sm:$0xff]   ;;  %v497_v20 = vld [vmem:[%s896_s2] ss:$0 sm:$0xff]  ;;  %v642_v57 = vld [vmem:[#allocation8 + $0x38] sm:$0xff]   ;;  %p753_p9 = por %p752_p8, %p751_p7 }
  0x3b   :  { %558 = vmatpush3.bf16.msra.mxu0 %v627_v2  ;;  %578 = vmatpush3.bf16.msra.mxu1 %v635_v13  ;;  %v508_v38 = vld [vmem:[%s898_s4] ss:$0 sm:$0xff]  ;;  %v644_v59 = vld [vmem:[#allocation8 + $0x28] sm:$0xff]   ;;  %v645_v60 = vld [vmem:[#allocation8 + $0x20] sm:$0xff]  }
  0x3c   :  { %559 = vmatprep.subr.bf16.mxu0 %v782_v0  ;;  %579 = vmatprep.subr.bf16.mxu1 %v782_v0  ;;  %v643_v58 = vld [vmem:[#allocation8 + $0x30] sm:$0xff]   ;;  %v646_v61 = vld [vmem:[#allocation8 + $0x18] sm:$0xff]   ;;  %v648_v63 = vld [vmem:[#allocation8 + $0x8] sm:$0xff]   ;;  %p754_p10 = pnand %p753_p9, %p747_p6 }
  0x3d   :  { %v647_v62 = vld [vmem:[#allocation8 + $0x10] sm:$0xff]   ;;  %v649_v1 = vld [vmem:[#allocation8] sm:$0xff]  }
  0x3f   :  { %560 = vmatpush3.bf16.msra.mxu0 %v628_v3  ;;  %580 = vmatpush3.bf16.msra.mxu1 %v636_v14 }
  0x40   :  { %561 = vmatprep.subr.bf16.mxu0 %v782_v0  ;;  %581 = vmatprep.subr.bf16.mxu1 %v782_v0 }
  0x43   :  { %562 = vmatpush3.bf16.msra.mxu0 %v629_v4  ;;  %582 = vmatpush3.bf16.msra.mxu1 %v637_v15 }
  0x44   :  { %563 = vmatprep.subr.bf16.mxu0 %v782_v0  ;;  %583 = vmatprep.subr.bf16.mxu1 %v782_v0 }
  0x47   :  { %564 = vmatpush3.bf16.msra.mxu0 %v630_v6  ;;  %584 = vmatpush3.bf16.msra.mxu1 %v638_v16 }
  0x48   :  { %565 = vmatprep.subr.bf16.mxu0 %v782_v0  ;;  %585 = vmatprep.subr.bf16.mxu1 %v782_v0 }
  0x4b   :  { %566 = vmatpush3.bf16.msra.mxu0 %v631_v7  ;;  %586 = vmatpush3.bf16.msra.mxu1 %v639_v17 }
  0x4c   :  { %567 = vmatprep.subr.bf16.mxu0 %v782_v0  ;;  %587 = vmatprep.subr.bf16.mxu1 %v782_v0 }
  0x4f   :  { %568 = vmatpush3.bf16.msra.mxu0 %v632_v8  ;;  %588 = vmatpush3.bf16.msra.mxu1 %v640_v18 }
  0x50   :  { %569 = vmatprep.subr.bf16.mxu0 %v782_v0  ;;  %589 = vmatprep.subr.bf16.mxu1 %v782_v0 }
  0x53   :  { %570 = vmatpush3.bf16.msra.mxu0 %v633_v9  ;;  %590 = vmatpush3.bf16.msra.mxu1 %v641_v19 }
  0x54   :  { %595 = vmatprep.subr.bf16.mxu0 %v782_v0 }
  0x56   :  { %572 = vmatmul.mubr.bf16.vlgmr.msra.gmra.mxu0 %v102_v12 }
  0x57   :  { %611 = vmatprep.mubr.msk.bf16.mxu0 %vm783_vm0, %v782_v0  ;;  %596 = vmatpush3.bf16.msra.mxu0 %v642_v57 }
  0x58   :  { %597 = vmatprep.subr.bf16.mxu0 %v782_v0 }
  0x5b   :  { %598 = vmatpush3.bf16.msra.mxu0 %v643_v58 }
  0x5c   :  { %599 = vmatprep.subr.bf16.mxu0 %v782_v0 }
  0x5f   :  { %600 = vmatpush3.bf16.msra.mxu0 %v644_v59 }
  0x60   :  { %601 = vmatprep.subr.bf16.mxu0 %v782_v0 }
  0x63   :  { %602 = vmatpush3.bf16.msra.mxu0 %v645_v60 }
  0x64   :  { %603 = vmatprep.subr.bf16.mxu0 %v782_v0 }
  0x67   :  { %604 = vmatpush3.bf16.msra.mxu0 %v646_v61 }
  0x68   :  { %605 = vmatprep.subr.bf16.mxu0 %v782_v0 }
  0x6b   :  { %606 = vmatpush3.bf16.msra.mxu0 %v647_v62 }
  0x6c   :  { %607 = vmatprep.subr.bf16.mxu0 %v782_v0 }
  0x6f   :  { %608 = vmatpush3.bf16.msra.mxu0 %v648_v63 }
  0x70   :  { %609 = vmatprep.subr.bf16.mxu0 %v782_v0 }
  0x73   :  { %610 = vmatpush3.bf16.msra.mxu0 %v649_v1 }
 0x116   :  { %v191_v21 = vpop.f32.mrf.mxu0 }
 0x117   :  { %v192_v22 = vadd.f32 %v497_v20, %v191_v21 }
 0x118   :  { %v573_v23 = vpop.f32.mrf.mxu0 }
 0x119   :  { %v200_v24 = vmin.f32 %v192_v22, 0.0  ;;  %vm198_vm1 = vcmp.gt.f32.partialorder %v192_v22, 0.0 }
 0x11a   :  { %v194_v25 = vpop.f32.mrf.mxu0 }
 0x11b   :  { %v202_v26 = vmul.f32 1.442695, %v200_v24  ;;  %v195_v27 = vadd.f32 %v497_v20, %v194_v25 }
 0x11c   :  { %v574_v28 = vpop.f32.mrf.mxu0 }
 0x11d   :  { %650 = vpow2.f32 %v202_v26  ;;  %v201_v29 = vmin.f32 %v195_v27, 0.0  ;;  %vm199_vm2 = vcmp.gt.f32.partialorder %v195_v27, 0.0 }
 0x11f   :  { %v204_v30 = vmul.f32 1.442695, %v201_v29 }
 0x121   :  { %652 = vpow2.f32 %v204_v30 }
 0x12a   :  { %v651_v31 = vpop.eup %650 }
 0x12b   :  { %v506_v32 = vadd.f32 -1.0, %v651_v31 }
 0x12d   :  { %v208_v35 = vsel %vm198_vm1, %v192_v22, %v506_v32  ;;  %v519_v22 = vld [vmem:[%s900_s6] ss:$0 sm:$0xff] }
 0x12e   :  { %v653_v33 = vpop.eup %652 }
 0x12f   :  { %v507_v34 = vadd.f32 -1.0, %v653_v33 }
 0x131   :  { %v209_v36 = vsel %vm199_vm2, %v195_v27, %v507_v34 }
 0x132   :  { %v227_v37 = vpack.c.bf16 %v209_v36, %v208_v35 }
 0x134   :  { %592 = vmatmul.mubr.bf16.vlgmr.msra.gmra.mxu1 %v227_v37 }
 0x1f4   :  { %v316_v39 = vpop.f32.mrf.mxu1 }
 0x1f5   :  { %v317_v40 = vadd.f32 %v508_v38, %v316_v39 }
 0x1f6   :  { %v593_v41 = vpop.f32.mrf.mxu1 }
 0x1f7   :  { %v325_v42 = vmin.f32 %v317_v40, 0.0  ;;  %vm323_vm3 = vcmp.gt.f32.partialorder %v317_v40, 0.0 }
 0x1f8   :  { %v319_v43 = vpop.f32.mrf.mxu1 }
 0x1f9   :  { %v327_v44 = vmul.f32 1.442695, %v325_v42  ;;  %v320_v45 = vadd.f32 %v508_v38, %v319_v43 }
 0x1fa   :  { %v594_v46 = vpop.f32.mrf.mxu1 }
 0x1fb   :  { %654 = vpow2.f32 %v327_v44  ;;  %v326_v47 = vmin.f32 %v320_v45, 0.0  ;;  %vm324_vm4 = vcmp.gt.f32.partialorder %v320_v45, 0.0 }
 0x1fd   :  { %v329_v48 = vmul.f32 1.442695, %v326_v47 }
 0x1ff   :  { %656 = vpow2.f32 %v329_v48 }
 0x208   :  { %v655_v49 = vpop.eup %654 }
 0x209   :  { %v517_v50 = vadd.f32 -1.0, %v655_v49 }
 0x20b   :  { %v333_v51 = vsel %vm323_vm3, %v317_v40, %v517_v50 }
 0x20c   :  { %v657_v52 = vpop.eup %656  ;;  %v335_v53 = vmul.f32 %v333_v51, %v333_v51 }
 0x20d   :  { %v518_v54 = vadd.f32 -1.0, %v657_v52 }
 0x20e   :  { %337 = vadd.xlane.f32.xlu0 %v335_v53 }
 0x20f   :  { %v334_v55 = vsel %vm324_vm4, %v320_v45, %v518_v54 }
 0x210   :  { %v336_v56 = vmul.f32 %v334_v55, %v334_v55 }
 0x212   :  { %339 = vadd.xlane.f32.xlu0 %v336_v56 }
 0x297   :  { %v338_v2 = vpop.xlane.xlu0 %337 }
 0x298   :  { %658 = vrsqrt.f32 %v338_v2  ;;  %vm343_vm5 = vcmp.eq.f32.partialorder %v338_v2, inf  ;;  %v346_v6 = vand.u32 2147483648, %v338_v2  ;;  %vm345_vm6 = vcmp.eq.f32.partialorder %v338_v2, 0.0 }
 0x29b   :  { %v340_v3 = vpop.xlane.xlu0 %339 }
 0x29c   :  { %660 = vrsqrt.f32 %v340_v3  ;;  %vm350_vm7 = vcmp.eq.f32.partialorder %v340_v3, inf  ;;  %v353_v12 = vand.u32 2147483648, %v340_v3  ;;  %vm352_vm8 = vcmp.eq.f32.partialorder %v340_v3, 0.0 }
 0x2a5   :  { %v659_v4 = vpop.eup %658 }
 0x2a6   :  { %v342_v5 = vmul.f32 %v659_v4, %v338_v2 }
 0x2a8   :  { %v344_v7 = vsel %vm343_vm5, %v338_v2, %v342_v5 }
 0x2a9   :  { %v661_v8 = vpop.eup %660  ;;  %v347_v9 = vsel %vm345_vm6, %v346_v6, %v344_v7 }
 0x2aa   :  { %v355_v10 = vmax.f32 %v347_v9, 1e-10  ;;  %v349_v11 = vmul.f32 %v661_v8, %v340_v3 }
 0x2ac   :  { %662 = vrcp.f32 %v355_v10  ;;  %v351_v13 = vsel %vm350_vm7, %v340_v3, %v349_v11 }
 0x2ad   :  { %v354_v0 = vsel %vm352_vm8, %v353_v12, %v351_v13 }
 0x2ae   :  { %v356_v14 = vmax.f32 %v354_v0, 1e-10 }
 0x2b0   :  { %664 = vrcp.f32 %v356_v14 }
 0x2b9   :  { %v663_v15 = vpop.eup %662 }
 0x2ba   :  { %v358_v16 = vmul.f32 10.0, %v663_v15 }
 0x2bc   :  { %v361_v19 = vmul.f32 %v358_v16, %v333_v51 }
 0x2bd   :  { %v665_v17 = vpop.eup %664 }
 0x2be   :  { %v360_v18 = vmul.f32 10.0, %v665_v17 }
 0x2c0   :  { %v362_v20 = vmul.f32 %v360_v18, %v334_v55 }
 0x2c2   :  { %v380_v21 = vpack.c.bf16 %v362_v20, %v361_v19 }
 0x2c4   :  { %612 = vmatmul.mubr.bf16.vlgmr.msra.gmra.mxu0 %v380_v21 }
 0x384   :  { %v469_v23 = vpop.f32.mrf.mxu0 }
 0x385   :  { %v470_v24 = vadd.f32 %v519_v22, %v469_v23 }
 0x386   :  { %v613_v25 = vpop.f32.mrf.mxu0 }
 0x387   :  { %476 = vst [vmem:[#allocation10] sm:$0xff] %v470_v24 }
 0x388   :  { %v472_v26 = vpop.f32.mrf.mxu0 }
 0x389   :  { %v473_v27 = vadd.f32 %v519_v22, %v472_v26 }
 0x38a   :  { %v614_v28 = vpop.f32.mrf.mxu0 }
 0x38b   :  { %477 = vst [vmem:[#allocation10 + $0x8] sm:$0xff] %v473_v27 }
 0x38c   :  { %757 = shalt.err (!%p754_p10)
}
 0x38d   :  { %489 = dma.vmem_to_hbm [thread:$0]  %s484_s26, 256, %s901_s7, [#allocation4], %s778_s11, %s778_s11, %s779_s12  }
 0x38e   :  { %772 = dma.done.wait [#allocation4], 256  }
 0x38f   :  { %773 = vsyncadd [#allocation4], 4294967040 }
 0x390   :  { %493 = vsyncpa [#allocation3], 1 }
 0x391   :  { %494 = vsyncpa [#allocation6], 1 }
 0x392   :  { %495 = vsyncpa [#allocation9], 1 }
 0x393   :  { %496 = vsyncpa [#allocation4], 1 }

</bundles_post_ra>
